<compile_context>
chip_gen: v7x
topology: tpu7x:2x2x1
jax: 0.10.0
libtpu: 0.0.40
codegen_flags: <defaults>
</compile_context>

<pallas_src>
import functools
import math

import jax
import jax.numpy as jnp
from jax.experimental import pallas as pl
from jax.experimental.pallas import tpu as pltpu


def _round_up(a: int, b: int) -> int:
    return ((a + b - 1) // b) * b


def _row_align(dtype) -> int:
    # Sublane packing: 8 rows for 32-bit, 16 for 16-bit, 32 for 8-bit dtypes.
    return max(8, 32 // jnp.dtype(dtype).itemsize)


def _choose_tk(d_ff: int, max_tk: int) -> int:
    """Largest d_ff chunk <= max_tk that divides d_ff (multiple of 128 if possible)."""
    if d_ff <= max_tk:
        return d_ff
    t = (max_tk // 128) * 128
    while t >= 128:
        if d_ff % t == 0:
            return t
        t -= 128
    return d_ff


# ---------------------------------------------------------------------------
# FeedForward sublayer:  relu(x @ W1 + b1) @ W2 + b2   (dropout = eval identity)
# ---------------------------------------------------------------------------
def _ffn_kernel(x_ref, w1_ref, b1_ref, w2_ref, b2_ref, o_ref, acc_ref):
    """One (row-tile, d_ff-chunk) step; k (axis 1) is the d_ff reduction axis."""
    k = pl.program_id(1)

    @pl.when(k == 0)
    def _():
        acc_ref[...] = jnp.zeros_like(acc_ref)

    # MXU in native dtype, f32 accumulation; bias + ReLU in f32.
    h = jnp.dot(x_ref[...], w1_ref[...], preferred_element_type=jnp.float32)
    h = jnp.maximum(h + b1_ref[...].astype(jnp.float32), 0.0)
    # Dropout: identity (eval mode).
    acc_ref[...] += jnp.dot(h.astype(w2_ref.dtype), w2_ref[...],
                            preferred_element_type=jnp.float32)

    @pl.when(k == pl.num_programs(1) - 1)
    def _():
        o_ref[...] = (acc_ref[...] + b2_ref[...].astype(jnp.float32)).astype(o_ref.dtype)


def feed_forward(x, w1, b1, w2, b2, *, tile_m=256, max_tk=1024):
    """x: (..., d_model) -> (..., d_model).

    Weights are pre-transposed vs torch nn.Linear:
      W1: (d_model, d_ff) == linear_1.weight.T ; W2: (d_ff, d_model) == linear_2.weight.T
    """
    orig_shape = x.shape
    d_model = orig_shape[-1]
    d_ff = w1.shape[1]

    x2d = x.reshape(-1, d_model)
    M = x2d.shape[0]

    align = _row_align(x.dtype)
    tm = _round_up(max(align, min(tile_m, _round_up(M, align))), align)
    M_pad = _round_up(M, tm)
    if M_pad != M:
        x2d = jnp.pad(x2d, ((0, M_pad - M), (0, 0)))

    tk = _choose_tk(d_ff, max_tk)
    grid = (M_pad // tm, d_ff // tk)

    b1_2d = b1.reshape(1, d_ff).astype(jnp.float32)
    b2_2d = b2.reshape(1, d_model).astype(jnp.float32)

    # Rough per-step VMEM footprint (double-buffered ins/outs + f32 accumulator).
    isz = x2d.dtype.itemsize
    vmem_bytes = 2 * (tm * d_model * isz
                      + d_model * tk * w1.dtype.itemsize
                      + tk * 4 + d_model * 4
                      + tk * d_model * w2.dtype.itemsize
                      + tm * d_model * isz)
    vmem_bytes += tm * d_model * 4 + tm * tk * 4
    vmem_limit = int(min(64 * 2**20, max(32 * 2**20, int(1.5 * vmem_bytes))))

    n_row_tiles = grid[0]
    cost = pl.CostEstimate(
        flops=4 * M_pad * d_model * d_ff,
        transcendentals=0,
        bytes_accessed=int(2 * M_pad * d_model * isz
                           + n_row_tiles * (w1.size * w1.dtype.itemsize
                                            + w2.size * w2.dtype.itemsize
                                            + 4 * (b1_2d.size + b2_2d.size))),
    )

    out = pl.pallas_call(
        _ffn_kernel,
        out_shape=jax.ShapeDtypeStruct((M_pad, d_model), x.dtype),
        grid_spec=pltpu.PrefetchScalarGridSpec(
            num_scalar_prefetch=0,
            grid=grid,
            in_specs=[
                pl.BlockSpec((tm, d_model), lambda i, k: (i, 0)),   # x row tile
                pl.BlockSpec((d_model, tk), lambda i, k: (0, k)),   # W1 chunk
                pl.BlockSpec((1, tk), lambda i, k: (0, k)),         # b1 chunk (f32)
                pl.BlockSpec((tk, d_model), lambda i, k: (k, 0)),   # W2 chunk
                pl.BlockSpec((1, d_model), lambda i, k: (0, 0)),    # b2 (f32)
            ],
            out_specs=pl.BlockSpec((tm, d_model), lambda i, k: (i, 0)),
            scratch_shapes=[pltpu.VMEM((tm, d_model), jnp.float32)],
        ),
        compiler_params=pltpu.CompilerParams(
            dimension_semantics=("parallel", "arbitrary"),
            vmem_limit_bytes=vmem_limit),
        cost_estimate=cost,
    )(x2d, w1, b1_2d, w2, b2_2d)

    return out[:M].reshape(orig_shape)


# ---------------------------------------------------------------------------
# LayerNormalisation (torch spec: unbiased std, eps added to std, scalar alpha/bias)
# ---------------------------------------------------------------------------
def _layer_norm_kernel(params_ref, x_ref, o_ref, *, eps):
    x = x_ref[...].astype(jnp.float32)
    n = x.shape[-1]
    mean = jnp.mean(x, axis=-1, keepdims=True)
    d = x - mean
    var = jnp.sum(d * d, axis=-1, keepdims=True) * (1.0 / (n - 1))  # Bessel (torch.std)
    std = jnp.sqrt(var)
    alpha = params_ref[0]
    bias = params_ref[1]
    o_ref[...] = (alpha * d / (std + eps) + bias).astype(o_ref.dtype)


def layer_norm(x, alpha, bias, eps=1e-6, *, tile_m=256):
    orig_shape = x.shape
    d_model = orig_shape[-1]
    x2d = x.reshape(-1, d_model)
    M = x2d.shape[0]

    align = _row_align(x.dtype)
    tm = _round_up(max(align, min(tile_m, _round_up(M, align))), align)
    M_pad = _round_up(M, tm)
    if M_pad != M:
        x2d = jnp.pad(x2d, ((0, M_pad - M), (0, 0)))

    params = jnp.asarray([alpha, bias], dtype=jnp.float32)

    out = pl.pallas_call(
        functools.partial(_layer_norm_kernel, eps=float(eps)),
        out_shape=jax.ShapeDtypeStruct((M_pad, d_model), x.dtype),
        grid_spec=pltpu.PrefetchScalarGridSpec(
            num_scalar_prefetch=0,
            grid=(M_pad // tm,),
            in_specs=[
                pl.BlockSpec(memory_space=pltpu.MemorySpace.SMEM),  # [alpha, bias]
                pl.BlockSpec((tm, d_model), lambda i: (i, 0)),
            ],
            out_specs=pl.BlockSpec((tm, d_model), lambda i: (i, 0)),
        ),
        compiler_params=pltpu.CompilerParams(dimension_semantics=("parallel",)),
    )(params, x2d)

    return out[:M].reshape(orig_shape)


# ---------------------------------------------------------------------------
# Encoder.forward: x -> layer_n(...layer_1(x, mask)...) -> LayerNormalisation
# ---------------------------------------------------------------------------
def encoder_forward(x, mask, layer_params, alpha, bias, eps=1e-6):
    del mask  # TODO(synk): spec's layer definitions (and mask usage) not provided.
    for (w1, b1, w2, b2) in layer_params:
        x = feed_forward(x, w1, b1, w2, b2)
    return layer_norm(x, alpha, bias, eps)


def init_ffn_params(key, d_model, d_ff, dtype=jnp.bfloat16):
    """nn.Linear-style U(-1/sqrt(fan_in), 1/sqrt(fan_in)); weights pre-transposed."""
    k1, k2, k3, k4 = jax.random.split(key, 4)
    bound1 = 1.0 / math.sqrt(d_model)
    bound2 = 1.0 / math.sqrt(d_ff)
    w1 = jax.random.uniform(k1, (d_model, d_ff), jnp.float32, -bound1, bound1).astype(dtype)
    b1 = jax.random.uniform(k2, (d_ff,), jnp.float32, -bound1, bound1)
    w2 = jax.random.uniform(k3, (d_ff, d_model), jnp.float32, -bound2, bound2).astype(dtype)
    b2 = jax.random.uniform(k4, (d_model,), jnp.float32, -bound2, bound2)
    return w1, b1, w2, b2


def reference_encoder(x, mask, layer_params, alpha, bias, eps):
    """Pure-JAX reference mirroring the kernel's dtype handling."""
    del mask
    for (w1, b1, w2, b2) in layer_params:
        h = jnp.maximum(jnp.dot(x, w1, preferred_element_type=jnp.float32) + b1, 0.0)
        y = jnp.dot(h.astype(w2.dtype), w2, preferred_element_type=jnp.float32) + b2
        x = y.astype(x.dtype)
    xf = x.astype(jnp.float32)
    mean = xf.mean(axis=-1, keepdims=True)
    d = xf - mean
    var = jnp.sum(d * d, axis=-1, keepdims=True) / (xf.shape[-1] - 1)
    return (alpha * d / (jnp.sqrt(var) + eps) + bias).astype(x.dtype)


if __name__ == "__main__":
    batch, seq, d_model, d_ff, n_layers = 2, 20, 128, 256, 2
    act_dtype = jnp.bfloat16  # MXU-native inputs; accumulation stays f32 in-kernel

    key = jax.random.PRNGKey(0)
    kx, kp = jax.random.split(key)
    x = jax.random.normal(kx, (batch, seq, d_model), jnp.float32).astype(act_dtype)
    mask = jnp.ones((batch, 1, seq, seq), dtype=jnp.bool_)  # unused by FFN stand-in

    layer_keys = jax.random.split(kp, n_layers)
    layer_params = [init_ffn_params(k, d_model, d_ff, act_dtype) for k in layer_keys]
    alpha, bias, eps = 1.0, 0.0, 1e-6  # LayerNormalisation init values

    y = jax.block_until_ready(encoder_forward(x, mask, layer_params, alpha, bias, eps))

    y_ref = reference_encoder(x, mask, layer_params, alpha, bias, eps)
    assert y.shape == x.shape
    err = float(jnp.max(jnp.abs(y.astype(jnp.float32) - y_ref.astype(jnp.float32))))
    assert err < 5e-2, f"max abs error {err}"
    print("KERNEL_OK")
</pallas_src>

<mosaic_0001>
module attributes {stable_mosaic.version = 11 : i64} {
  func.func @_ffn_kernel(%arg0: i32, %arg1: i32, %arg2: memref<48x128xbf16, #tpu.memory_space<vmem>>, %arg3: memref<128x256xbf16, #tpu.memory_space<vmem>>, %arg4: memref<1x256xf32, #tpu.memory_space<vmem>>, %arg5: memref<256x128xbf16, #tpu.memory_space<vmem>>, %arg6: memref<1x128xf32, #tpu.memory_space<vmem>>, %arg7: memref<48x128xbf16, #tpu.memory_space<vmem>>, %arg8: memref<48x128xf32, #tpu.memory_space<vmem>>) attributes {dimension_semantics = [#tpu.dimension_semantics<parallel>, #tpu.dimension_semantics<arbitrary>], iteration_bounds = array<i64: 1, 1>, scalar_prefetch = 0 : i64, scratch_operands = 1 : i64, tpu.core_type = #tpu.core_type<tc>, window_params = [{transform_indices = @transform_0, window_bounds = array<i64: 48, 128>}, {transform_indices = @transform_1, window_bounds = array<i64: 128, 256>}, {transform_indices = @transform_2, window_bounds = array<i64: 1, 256>}, {transform_indices = @transform_3, window_bounds = array<i64: 256, 128>}, {pipeline_mode = #tpu.pipeline_mode<synchronous>, transform_indices = @transform_4, window_bounds = array<i64: 1, 128>}, {transform_indices = @transform_5, window_bounds = array<i64: 48, 128>}]} {
    %c0_i32 = arith.constant 0 : i32
    %0 = arith.cmpi eq, %arg1, %c0_i32 : i32
    %1 = arith.extui %0 : i1 to i32
    %c0_i32_0 = arith.constant 0 : i32
    %2 = arith.cmpi ne, %1, %c0_i32_0 : i32
    scf.if %2 {
      %cst_16 = arith.constant 0.000000e+00 : f32
      %20 = vector.broadcast %cst_16 : f32 to vector<48x128xf32>
      %c0_17 = arith.constant 0 : index
      %c0_18 = arith.constant 0 : index
      %21 = vector.load %arg8[%c0_17, %c0_18] : memref<48x128xf32, #tpu.memory_space<vmem>>, vector<48x128xf32>
      tpu.vector_store %arg8[%c0_17, %c0_18], %20 {strides = array<i32>} : memref<48x128xf32, #tpu.memory_space<vmem>>, vector<48x128xf32>,
    } else {
    }
    %c0 = arith.constant 0 : index
    %c0_1 = arith.constant 0 : index
    %3 = vector.load %arg2[%c0, %c0_1] : memref<48x128xbf16, #tpu.memory_space<vmem>>, vector<48x128xbf16>
    %c0_2 = arith.constant 0 : index
    %c0_3 = arith.constant 0 : index
    %4 = vector.load %arg3[%c0_2, %c0_3] : memref<128x256xbf16, #tpu.memory_space<vmem>>, vector<128x256xbf16>
    %cst = arith.constant dense<0.000000e+00> : vector<48x256xf32>
    %5 = tpu.matmul %3, %4, %cst {dimension_numbers = #tpu.dot_dimension_numbers<[1], [0], [0], [1], [0, 0, 1, 1], [], []>} : vector<48x128xbf16>, vector<128x256xbf16>, vector<48x256xf32> -> vector<48x256xf32>
    %c0_4 = arith.constant 0 : index
    %c0_5 = arith.constant 0 : index
    %6 = vector.load %arg4[%c0_4, %c0_5] : memref<1x256xf32, #tpu.memory_space<vmem>>, vector<1x256xf32>
    %7 = vector.broadcast %6 : vector<1x256xf32> to vector<48x256xf32>
    %8 = arith.addf %5, %7 : vector<48x256xf32>
    %cst_6 = arith.constant 0.000000e+00 : f32
    %9 = vector.broadcast %cst_6 : f32 to vector<48x256xf32>
    %10 = arith.maximumf %8, %9 : vector<48x256xf32>
    %c0_7 = arith.constant 0 : index
    %c0_8 = arith.constant 0 : index
    %11 = vector.load %arg8[%c0_7, %c0_8] : memref<48x128xf32, #tpu.memory_space<vmem>>, vector<48x128xf32>
    %12 = arith.truncf %10 : vector<48x256xf32> to vector<48x256xbf16>
    %c0_9 = arith.constant 0 : index
    %c0_10 = arith.constant 0 : index
    %13 = vector.load %arg5[%c0_9, %c0_10] : memref<256x128xbf16, #tpu.memory_space<vmem>>, vector<256x128xbf16>
    %cst_11 = arith.constant dense<0.000000e+00> : vector<48x128xf32>
    %14 = tpu.matmul %12, %13, %cst_11 {dimension_numbers = #tpu.dot_dimension_numbers<[1], [0], [0], [1], [0, 0, 1, 1], [], []>} : vector<48x256xbf16>, vector<256x128xbf16>, vector<48x128xf32> -> vector<48x128xf32>
    %15 = arith.addf %11, %14 : vector<48x128xf32>
    %c0_12 = arith.constant 0 : index
    %c0_13 = arith.constant 0 : index
    %16 = vector.load %arg8[%c0_12, %c0_13] : memref<48x128xf32, #tpu.memory_space<vmem>>, vector<48x128xf32>
    tpu.vector_store %arg8[%c0_12, %c0_13], %15 {strides = array<i32>} : memref<48x128xf32, #tpu.memory_space<vmem>>, vector<48x128xf32>,
    %c0_i32_14 = arith.constant 0 : i32
    %17 = arith.cmpi eq, %arg1, %c0_i32_14 : i32
    %18 = arith.extui %17 : i1 to i32
    %c0_i32_15 = arith.constant 0 : i32
    %19 = arith.cmpi ne, %18, %c0_i32_15 : i32
    scf.if %19 {
      %c0_16 = arith.constant 0 : index
      %c0_17 = arith.constant 0 : index
      %20 = vector.load %arg8[%c0_16, %c0_17] : memref<48x128xf32, #tpu.memory_space<vmem>>, vector<48x128xf32>
      %c0_18 = arith.constant 0 : index
      %c0_19 = arith.constant 0 : index
      %21 = vector.load %arg6[%c0_18, %c0_19] : memref<1x128xf32, #tpu.memory_space<vmem>>, vector<1x128xf32>
      %22 = vector.broadcast %21 : vector<1x128xf32> to vector<48x128xf32>
      %23 = arith.addf %20, %22 : vector<48x128xf32>
      %24 = arith.truncf %23 : vector<48x128xf32> to vector<48x128xbf16>
      %c0_20 = arith.constant 0 : index
      %c0_21 = arith.constant 0 : index
      %25 = vector.load %arg7[%c0_20, %c0_21] : memref<48x128xbf16, #tpu.memory_space<vmem>>, vector<48x128xbf16>
      tpu.vector_store %arg7[%c0_20, %c0_21], %24 {strides = array<i32>} : memref<48x128xbf16, #tpu.memory_space<vmem>>, vector<48x128xbf16>,
    } else {
    }
    return
  }
  func.func @transform_0(%arg0: i32, %arg1: i32) -> (i32, i32) {
    %c0_i32 = arith.constant 0 : i32
    %c0_i32_0 = arith.constant 0 : i32
    return %arg0, %c0_i32 : i32, i32
  }
  func.func @transform_1(%arg0: i32, %arg1: i32) -> (i32, i32) {
    %c0_i32 = arith.constant 0 : i32
    %c0_i32_0 = arith.constant 0 : i32
    return %c0_i32, %arg1 : i32, i32
  }
  func.func @transform_2(%arg0: i32, %arg1: i32) -> (i32, i32) {
    %c0_i32 = arith.constant 0 : i32
    %c0_i32_0 = arith.constant 0 : i32
    return %c0_i32, %arg1 : i32, i32
  }
  func.func @transform_3(%arg0: i32, %arg1: i32) -> (i32, i32) {
    %c0_i32 = arith.constant 0 : i32
    %c0_i32_0 = arith.constant 0 : i32
    return %arg1, %c0_i32 : i32, i32
  }
  func.func @transform_4(%arg0: i32, %arg1: i32) -> (i32, i32) {
    %c0_i32 = arith.constant 0 : i32
    %c0_i32_0 = arith.constant 0 : i32
    %c0_i32_1 = arith.constant 0 : i32
    return %c0_i32, %c0_i32_0 : i32, i32
  }
  func.func @transform_5(%arg0: i32, %arg1: i32) -> (i32, i32) {
    %c0_i32 = arith.constant 0 : i32
    %c0_i32_0 = arith.constant 0 : i32
    return %arg0, %c0_i32 : i32, i32
  }
}

</mosaic_0001>

<bundles_post_ra>
// kernel: tpu_custom_call.1
= control target key start
LH: loop header
LB: loop body
LE: loop exit
PB: predicated region body
PF: predicated region fallthrough
CT: control target
= control target key end

     0   :  { %10 = vsyncpa [#allocation4], 0  ;;  %s906_s0 = inlined_call_operand.hbm [shape: bf16[48,128], index: 0, kind: input, shape index: {}]   ;;  %s907_s1 = inlined_call_operand.hbm [shape: bf16[128,256], index: 1, kind: input, shape index: {}]   ;;  %s908_s2 = inlined_call_operand.vmem [shape: f32[1,256], index: 2, kind: input, shape index: {}]   ;;  %s909_s3 = inlined_call_operand.hbm [shape: bf16[256,128], index: 3, kind: input, shape index: {}]   ;;  %s910_s4 = inlined_call_operand.vmem [shape: f32[1,128], index: 4, kind: input, shape index: {}]   ;;  %s911_s5 = inlined_call_operand.hbm [shape: bf16[48,128], index: 5, kind: output, shape index: {}]  }
   0x1   :  { %11 = vsyncpa [#allocation7], 0 }
   0x2   :  { %12 = vsyncpa [#allocation5], 0  ;;  %s804_s18 = smov [#allocation6]   ;;  %s710_s22 = scalar_lea.hbm %s907_s1, 2048 }
   0x3   :  { %s30_s19 = sshll.u32 %s804_s18, 4  ;;  %p711_p0 = scmp.ne.s32.totalorder %s907_s1, %s710_s22  ;;  %s31_s19 = int_to_ptr.vmem [resolvable:$true] %s30_s19 }
   0x4   :  { %p714_p1 = scmp.lt.u32.totalorder %s710_s22, %s907_s1 }
   0x6   :  { %p716_p2 = pnand %p714_p1, %p711_p0 }
   0x8   :  { %719 = shalt.err (!%p716_p2)
}
   0x9   :  { %s720_s27 = scalar_lea.vmem %s31_s19, 2048  ;;  %p725_p4 = scmp.lt.s32.totalorder %s31_s19, %s31_s19 }
   0xa   :  { %p721_p3 = scmp.ne.s32.totalorder %s31_s19, %s720_s27  ;;  %p726_p5 = scmp.lt.s32.totalorder %s720_s27, %s720_s27 }
   0xc   :  { %p727_p6 = por %p726_p5, %p725_p4 }
   0xe   :  { %p728_p7 = pnand %p727_p6, %p721_p3 }
  0x10   :  { %731 = shalt.err (!%p728_p7)
}
  0x11   :  { %s805_s28 = smov 128   ;;  %s806_s29 = smov 8  }
  0x12   :  { %36 = dma.hbm_to_vmem [thread:$0]  %s907_s1, 2048, %s31_s19, [#allocation7], %s805_s28, %s805_s28, %s806_s29  }
  0x13   :  { %s807_s7 = smov [#allocation3]   ;;  %s732_s11 = scalar_lea.hbm %s906_s0, 384 }
  0x14   :  { %s18_s8 = sshll.u32 %s807_s7, 4  ;;  %p733_p8 = scmp.ne.s32.totalorder %s906_s0, %s732_s11  ;;  %s19_s8 = int_to_ptr.vmem [resolvable:$true] %s18_s8 }
  0x15   :  { %p736_p9 = scmp.lt.u32.totalorder %s732_s11, %s906_s0 }
  0x17   :  { %p738_p10 = pnand %p736_p9, %p733_p8 }
  0x19   :  { %741 = shalt.err (!%p738_p10)
}
  0x1a   :  { %s742_s16 = scalar_lea.vmem %s19_s8, 384  ;;  %p747_p12 = scmp.lt.s32.totalorder %s19_s8, %s19_s8 }
  0x1b   :  { %p743_p11 = scmp.ne.s32.totalorder %s19_s8, %s742_s16  ;;  %p748_p13 = scmp.lt.s32.totalorder %s742_s16, %s742_s16 }
  0x1d   :  { %p749_p0 = por %p748_p13, %p747_p12 }
  0x1f   :  { %p750_p1 = pnand %p749_p0, %p743_p11 }
  0x21   :  { %753 = shalt.err (!%p750_p1)
}
  0x22   :  { %s808_s1 = smov 64   ;;  %s809_s17 = smov 4  }
  0x23   :  { %24 = dma.hbm_to_vmem [thread:$0]  %s906_s0, 384, %s19_s8, [#allocation4], %s808_s1, %s808_s1, %s809_s17  }
  0x24   :  { %s810_s20 = smov [#allocation8]   ;;  %s754_s24 = scalar_lea.hbm %s909_s3, 2048 }
  0x25   :  { %s44_s21 = sshll.u32 %s810_s20, 4  ;;  %p755_p2 = scmp.ne.s32.totalorder %s909_s3, %s754_s24  ;;  %s45_s21 = int_to_ptr.vmem [resolvable:$true] %s44_s21 }
  0x26   :  { %p758_p3 = scmp.lt.u32.totalorder %s754_s24, %s909_s3 }
  0x28   :  { %p760_p4 = pnand %p758_p3, %p755_p2 }
  0x2a   :  { %763 = shalt.err (!%p760_p4)
}
  0x2b   :  { %s764_s29 = scalar_lea.vmem %s45_s21, 2048  ;;  %p769_p6 = scmp.lt.s32.totalorder %s45_s21, %s45_s21 }
  0x2c   :  { %p765_p5 = scmp.ne.s32.totalorder %s45_s21, %s764_s29  ;;  %p770_p7 = scmp.lt.s32.totalorder %s764_s29, %s764_s29 }
  0x2e   :  { %p771_p8 = por %p770_p7, %p769_p6 }
  0x30   :  { %p772_p9 = pnand %p771_p8, %p765_p5 }
  0x32   :  { %775 = shalt.err (!%p772_p9)
}
  0x33   :  { %50 = dma.hbm_to_vmem [thread:$0]  %s909_s3, 2048, %s45_s21, [#allocation7], %s808_s1, %s808_s1, %s809_s17  }
  0x34   :  { %798 = dma.done.wait [#allocation4], 384  }
  0x35   :  { %799 = vsyncadd [#allocation4], 4294966912 }
  0x36   :  { %800 = dma.done.wait [#allocation7], 4096  }
  0x37   :  { %801 = vsyncadd [#allocation7], 4294963200  ;;  %v811_v0 = vmov 0   ;;  %v667_v1 = vld [vmem:[#allocation6 + $0x4] ss:$8 sps:$4 sm:$0xff]   ;;  %v698_v16 = vld [vmem:[#allocation8 + $0x50] sm:$0xff]   ;;  %v97_v36 = vlaneseq }
  0x38   :  { %237 = vmatprep.mubr.bf16.mxu0 %v811_v0  ;;  %v669_v2 = vld [vmem:[#allocation6] ss:$8 sps:$4 sm:$0xff]   ;;  %205 = vmatprep.subr.bf16.mxu0 %v667_v1  ;;  %v670_v3 = vld [vmem:[#allocation6 + $0x14] ss:$8 sps:$4 sm:$0xff]   ;;  %v672_v4 = vld [vmem:[#allocation6 + $0x10] ss:$8 sps:$4 sm:$0xff]  }
  0x39   :  { %206 = vmatpush1.bf16.msra.mxu0 %v669_v2  ;;  %v673_v5 = vld [vmem:[#allocation6 + $0x24] ss:$8 sps:$4 sm:$0xff]   ;;  %v675_v6 = vld [vmem:[#allocation6 + $0x20] ss:$8 sps:$4 sm:$0xff]   ;;  %v676_v7 = vld [vmem:[#allocation6 + $0x34] ss:$8 sps:$4 sm:$0xff]  }
  0x3a   :  { %207 = vmatprep.subr.bf16.mxu0 %v670_v3  ;;  %v678_v8 = vld [vmem:[#allocation6 + $0x30] ss:$8 sps:$4 sm:$0xff]   ;;  %v679_v9 = vld [vmem:[#allocation6 + $0x44] ss:$8 sps:$4 sm:$0xff]   ;;  %v681_v10 = vld [vmem:[#allocation6 + $0x40] ss:$8 sps:$4 sm:$0xff]  }
  0x3b   :  { %v682_v11 = vld [vmem:[#allocation6 + $0x54] ss:$8 sps:$4 sm:$0xff]   ;;  %v694_v12 = vld [vmem:[#allocation8 + $0x40] sm:$0xff]   ;;  %v696_v14 = vld [vmem:[#allocation8 + $0x48] sm:$0xff]   ;;  %v98_v37 = vshrl.u32 %v97_v36, 7 }
  0x3c   :  { %v695_v13 = vld [vmem:[#allocation8] sm:$0xff]   ;;  %624 = vmatprep.subr.bf16.mxu1 %v694_v12  ;;  %v697_v15 = vld [vmem:[#allocation8 + $0x8] sm:$0xff]   ;;  %v684_v17 = vld [vmem:[#allocation6 + $0x50] ss:$8 sps:$4 sm:$0xff]  }
  0x3d   :  { %208 = vmatpush1.bf16.msra.mxu0 %v672_v4  ;;  %625 = vmatpush3.bf16.msra.mxu1 %v695_v13  ;;  %v685_v18 = vld [vmem:[#allocation6 + $0x64] ss:$8 sps:$4 sm:$0xff]   ;;  %v687_v19 = vld [vmem:[#allocation6 + $0x60] ss:$8 sps:$4 sm:$0xff]   ;;  %v699_v20 = vld [vmem:[#allocation8 + $0x10] sm:$0xff]   ;;  %v99_v38 = vsub.s32 0, %v98_v37 }
  0x3e   :  { %209 = vmatprep.subr.bf16.mxu0 %v673_v5  ;;  %626 = vmatprep.subr.bf16.mxu1 %v696_v14  ;;  %v700_v21 = vld [vmem:[#allocation8 + $0x58] sm:$0xff]   ;;  %v702_v24 = vld [vmem:[#allocation8 + $0x60] sm:$0xff]   ;;  %v691_v27 = vld [vmem:[#allocation3] sm:$0xff]   ;;  %v103_v40 = vsub.s32 1, %v98_v37 }
  0x3f   :  { %v688_v22 = vld [vmem:[#allocation6 + $0x74] ss:$8 sps:$4 sm:$0xff]   ;;  %v690_v25 = vld [vmem:[#allocation6 + $0x70] ss:$8 sps:$4 sm:$0xff]   ;;  %v703_v26 = vld [vmem:[#allocation8 + $0x20] sm:$0xff]  }
  0x40   :  { %v701_v23 = vld [vmem:[#allocation8 + $0x18] sm:$0xff]   ;;  %v704_v28 = vld [vmem:[#allocation8 + $0x68] sm:$0xff]   ;;  %v692_v29 = vld [vmem:[#allocation3 + $0x8] sm:$0xff]  }
  0x41   :  { %210 = vmatpush1.bf16.msra.mxu0 %v675_v6  ;;  %627 = vmatpush3.bf16.msra.mxu1 %v697_v15  ;;  %v693_v30 = vld [vmem:[#allocation3 + $0x10] sm:$0xff]   ;;  %v705_v31 = vld [vmem:[#allocation8 + $0x28] sm:$0xff]   ;;  %v706_v32 = vld [vmem:[#allocation8 + $0x70] sm:$0xff]  }
  0x42   :  { %211 = vmatprep.subr.bf16.mxu0 %v676_v7  ;;  %628 = vmatprep.subr.bf16.mxu1 %v698_v16  ;;  %v707_v33 = vld [vmem:[#allocation8 + $0x30] sm:$0xff]   ;;  %v708_v34 = vld [vmem:[#allocation8 + $0x78] sm:$0xff]   ;;  %v95_v39 = vld [vmem:[%s908_s2] sm:$0x3] }
  0x43   :  { %v709_v35 = vld [vmem:[#allocation8 + $0x38] sm:$0xff]   ;;  %v100_v41 = vrot.slane %v95_v39, %v99_v38  ;;  %v104_v42 = vrot.slane %v95_v39, %v103_v40 }
  0x45   :  { %212 = vmatpush1.bf16.msra.mxu0 %v678_v8  ;;  %629 = vmatpush3.bf16.msra.mxu1 %v699_v20 }
  0x46   :  { %213 = vmatprep.subr.bf16.mxu0 %v679_v9  ;;  %630 = vmatprep.subr.bf16.mxu1 %v700_v21 }
  0x49   :  { %214 = vmatpush1.bf16.msra.mxu0 %v681_v10  ;;  %631 = vmatpush3.bf16.msra.mxu1 %v701_v23 }
  0x4a   :  { %215 = vmatprep.subr.bf16.mxu0 %v682_v11  ;;  %632 = vmatprep.subr.bf16.mxu1 %v702_v24 }
  0x4d   :  { %216 = vmatpush1.bf16.msra.mxu0 %v684_v17  ;;  %633 = vmatpush3.bf16.msra.mxu1 %v703_v26 }
  0x4e   :  { %217 = vmatprep.subr.bf16.mxu0 %v685_v18  ;;  %634 = vmatprep.subr.bf16.mxu1 %v704_v28 }
  0x51   :  { %218 = vmatpush1.bf16.msra.mxu0 %v687_v19  ;;  %635 = vmatpush3.bf16.msra.mxu1 %v705_v31 }
  0x52   :  { %219 = vmatprep.subr.bf16.mxu0 %v688_v22  ;;  %636 = vmatprep.subr.bf16.mxu1 %v706_v32 }
  0x55   :  { %220 = vmatpush1.bf16.msra.mxu0 %v690_v25  ;;  %637 = vmatpush3.bf16.msra.mxu1 %v707_v33  ;;  %v594_v25 = vld [vmem:[%s910_s4] ss:$0 sm:$0xff]  ;;  %s812_s4 = smov [#allocation9]  }
  0x56   :  { %638 = vmatprep.subr.bf16.mxu1 %v708_v34  ;;  %s546_s8 = sshll.u32 %s812_s4, 4  ;;  %s547_s8 = int_to_ptr.vmem [resolvable:$true] %s546_s8 }
  0x57   :  { %s776_s9 = scalar_lea.vmem %s547_s8, 384  ;;  %p781_p11 = scmp.lt.s32.totalorder %s547_s8, %s547_s8 }
  0x58   :  { %238 = vmatmul.mubr.bf16.vlgmr.msra.gmra.mrb[0].mxu0 %v691_v27  ;;  %p777_p10 = scmp.ne.s32.totalorder %s547_s8, %s776_s9  ;;  %p782_p12 = scmp.lt.s32.totalorder %s776_s9, %s776_s9 }
  0x59   :  { %247 = vmatprep.mubr.bf16.mxu0 %v811_v0  ;;  %639 = vmatpush3.bf16.msra.mxu1 %v709_v35 }
  0x5a   :  { %p783_p13 = por %p782_p12, %p781_p11 }
  0x5c   :  { %p784_p0 = pnand %p783_p13, %p777_p10 }
  0x60   :  { %248 = vmatmul.mubr.bf16.gmra.mrb[4].mxu0 %v692_v29 }
  0x61   :  { %257 = vmatprep.mubr.bf16.mxu0 %v811_v0 }
  0x68   :  { %258 = vmatmul.mubr.bf16.gmra.mrb[8].mxu0 %v693_v30 }
 0x12b   :  { %v239_v43 = vpop.f32.mrb[0].mxu0 }
 0x12c   :  { %v240_v44 = vadd.f32 %v239_v43, %v100_v41  ;;  %v241_v45 = vpop.f32.mrb[1].mxu0 }
 0x12d   :  { %v242_v46 = vadd.f32 %v241_v45, %v104_v42  ;;  %v243_v47 = vpop.f32.mrb[2].mxu0 }
 0x12e   :  { %v244_v48 = vadd.f32 %v243_v47, %v100_v41  ;;  %v245_v49 = vpop.f32.mrb[3].mxu0  ;;  %v268_v51 = vmax.f32 %v240_v44, 0.0 }
 0x12f   :  { %v246_v50 = vadd.f32 %v245_v49, %v104_v42  ;;  %v269_v53 = vmax.f32 %v242_v46, 0.0 }
 0x130   :  { %v270_v52 = vmax.f32 %v244_v48, 0.0 }
 0x131   :  { %v271_v54 = vmax.f32 %v246_v50, 0.0 }
 0x132   :  { %v286_v55 = vpack.c.bf16 %v270_v52, %v268_v51 }
 0x133   :  { %v249_v56 = vpop.f32.mrb[4].mxu0  ;;  %v287_v57 = vpack.c.bf16 %v271_v54, %v269_v53 }
 0x134   :  { %v250_v58 = vadd.f32 %v249_v56, %v100_v41  ;;  %v251_v59 = vpop.f32.mrb[5].mxu0 }
 0x135   :  { %v252_v60 = vadd.f32 %v251_v59, %v104_v42  ;;  %v253_v61 = vpop.f32.mrb[6].mxu0  ;;  %452 = vmatprep.mubr.bf16.mxu1 %v287_v57 }
 0x136   :  { %v254_v62 = vadd.f32 %v253_v61, %v100_v41  ;;  %v255_v63 = vpop.f32.mrb[7].mxu0  ;;  %453 = vmatmul.mubr.bf16.vlgmr.msra.gmra.mrb[0].mxu1 %v286_v55  ;;  %v272_v1 = vmax.f32 %v250_v58, 0.0 }
 0x137   :  { %v256_v0 = vadd.f32 %v255_v63, %v104_v42  ;;  %v273_v3 = vmax.f32 %v252_v60, 0.0 }
 0x138   :  { %v274_v2 = vmax.f32 %v254_v62, 0.0 }
 0x139   :  { %v275_v4 = vmax.f32 %v256_v0, 0.0 }
 0x13a   :  { %v288_v5 = vpack.c.bf16 %v274_v2, %v272_v1 }
 0x13b   :  { %v289_v6 = vpack.c.bf16 %v275_v4, %v273_v3  ;;  %v259_v7 = vpop.f32.mrb[8].mxu0 }
 0x13c   :  { %v260_v8 = vadd.f32 %v259_v7, %v100_v41  ;;  %v261_v9 = vpop.f32.mrb[9].mxu0 }
 0x13d   :  { %v262_v10 = vadd.f32 %v261_v9, %v104_v42  ;;  %v263_v11 = vpop.f32.mrb[10].mxu0  ;;  %460 = vmatprep.mubr.bf16.mxu1 %v289_v6 }
 0x13e   :  { %v264_v12 = vadd.f32 %v263_v11, %v100_v41  ;;  %v265_v13 = vpop.f32.mrb[11].mxu0  ;;  %461 = vmatmul.mubr.bf16.gmra.mrb[4].mxu1 %v288_v5  ;;  %v276_v15 = vmax.f32 %v260_v8, 0.0 }
 0x13f   :  { %v266_v14 = vadd.f32 %v265_v13, %v104_v42  ;;  %v277_v17 = vmax.f32 %v262_v10, 0.0 }
 0x140   :  { %v278_v16 = vmax.f32 %v264_v12, 0.0 }
 0x141   :  { %v279_v18 = vmax.f32 %v266_v14, 0.0 }
 0x142   :  { %v290_v19 = vpack.c.bf16 %v278_v16, %v276_v15 }
 0x143   :  { %v291_v20 = vpack.c.bf16 %v279_v18, %v277_v17 }
 0x145   :  { %468 = vmatprep.mubr.bf16.mxu1 %v291_v20 }
 0x146   :  { %469 = vmatmul.mubr.bf16.gmra.mrb[8].mxu1 %v290_v19 }
 0x209   :  { %v640_v21 = vpop.f32.mrb[0].mxu1 }
 0x20a   :  { %v641_v22 = vpop.f32.mrb[1].mxu1 }
 0x20b   :  { %v642_v23 = vadd.f32 %v641_v22, %v640_v21  ;;  %v643_v24 = vpop.f32.mrb[2].mxu1 }
 0x20c   :  { %v644_v26 = vpop.f32.mrb[3].mxu1 }
 0x20d   :  { %v645_v27 = vadd.f32 %v644_v26, %v643_v24  ;;  %v505_v28 = vadd.f32 %v642_v23, %v594_v25 }
 0x20f   :  { %v506_v29 = vadd.f32 %v645_v27, %v594_v25 }
 0x211   :  { %v610_v30 = vpack.c.bf16 %v506_v29, %v505_v28  ;;  %v646_v31 = vpop.f32.mrb[4].mxu1 }
 0x212   :  { %v647_v32 = vpop.f32.mrb[5].mxu1 }
 0x213   :  { %611 = vst [vmem:[#allocation9] sm:$0xff] %v610_v30   ;;  %v648_v33 = vadd.f32 %v647_v32, %v646_v31  ;;  %v649_v34 = vpop.f32.mrb[6].mxu1 }
 0x214   :  { %v650_v35 = vpop.f32.mrb[7].mxu1 }
 0x215   :  { %v651_v36 = vadd.f32 %v650_v35, %v649_v34  ;;  %v507_v37 = vadd.f32 %v648_v33, %v594_v25 }
 0x217   :  { %v508_v38 = vadd.f32 %v651_v36, %v594_v25 }
 0x219   :  { %v615_v39 = vpack.c.bf16 %v508_v38, %v507_v37  ;;  %v652_v40 = vpop.f32.mrb[8].mxu1 }
 0x21a   :  { %v653_v41 = vpop.f32.mrb[9].mxu1 }
 0x21b   :  { %622 = vst [vmem:[#allocation9 + $0x8] sm:$0xff] %v615_v39   ;;  %v654_v42 = vadd.f32 %v653_v41, %v652_v40  ;;  %v655_v43 = vpop.f32.mrb[10].mxu1 }
 0x21c   :  { %v656_v44 = vpop.f32.mrb[11].mxu1 }
 0x21d   :  { %v657_v45 = vadd.f32 %v656_v44, %v655_v43  ;;  %v509_v46 = vadd.f32 %v654_v42, %v594_v25 }
 0x21f   :  { %v510_v47 = vadd.f32 %v657_v45, %v594_v25 }
 0x221   :  { %v620_v48 = vpack.c.bf16 %v510_v47, %v509_v46 }
 0x223   :  { %623 = vst [vmem:[#allocation9 + $0x10] sm:$0xff] %v620_v48  }
 0x224   :  { %787 = shalt.err (!%p784_p0)
}
 0x225   :  { %s788_s12 = scalar_lea.hbm %s911_s5, 384 }
 0x226   :  { %p789_p1 = scmp.ne.s32.totalorder %s911_s5, %s788_s12  ;;  %p792_p2 = scmp.lt.u32.totalorder %s788_s12, %s911_s5 }
 0x228   :  { %p794_p3 = pnand %p792_p2, %p789_p1 }
 0x22a   :  { %797 = shalt.err (!%p794_p3)
}
 0x22b   :  { %552 = dma.vmem_to_hbm [thread:$0]  %s547_s8, 384, %s911_s5, [#allocation5], %s808_s1, %s808_s1, %s809_s17  }
 0x22c   :  { %802 = dma.done.wait [#allocation5], 384  }
 0x22d   :  { %803 = vsyncadd [#allocation5], 4294966912 }
 0x22e   :  { %556 = vsyncpa [#allocation4], 1 }
 0x22f   :  { %557 = vsyncpa [#allocation7], 1 }
 0x230   :  { %558 = vsyncpa [#allocation5], 1 }

</bundles_post_ra>
